<compile_context>
chip_gen: v6e
topology: v6e:2x2x1
jax: 0.10.0
libtpu: 0.0.40
codegen_flags: <defaults>
</compile_context>

<pallas_src>
import functools

import jax
import jax.numpy as jnp
from jax import lax
from jax.experimental import pallas as pl
from jax.experimental.pallas import tpu as pltpu

EMBED_DIM = 512                      # ViT-B/32 embedding dim
CLIP_MEAN = (0.48145466, 0.4578275, 0.40821073)
CLIP_STD = (0.26862954, 0.26130258, 0.27577711)
NUM_TEMPLATES = 8                    # synthetic stand-in for imagenet_templates


def _round_up(x, m):
    return (x + m - 1) // m * m


def _choose_tk(f_pad, max_tk):
    """Largest multiple-of-128 divisor of f_pad that is <= max_tk.

    Guarantees zero padded K columns of w are streamed from HBM (the kernel
    is w-bandwidth-bound, so padded columns are pure waste).
    """
    n = f_pad // 128                       # f_pad is a multiple of 128
    cap = max(1, max_tk // 128)
    best = 1
    for d in range(1, n + 1):
        if n % d == 0 and d <= cap:
            best = d
    return 128 * best


# ---------------------------------------------------------------------------
# Fused kernel: K-tiled (x @ w) accumulation + directional-loss epilogue
# ---------------------------------------------------------------------------
def _fused_clip_direction_kernel(x_ref, w_ref, bias_ref, tdir_ref, loss_ref,
                                 acc_ref, *, batch, tk):
    k = pl.program_id(0)

    @pl.when(k == 0)
    def _():
        acc_ref[...] = jnp.zeros_like(acc_ref)

    # x is fully resident in VMEM; slice the current K chunk in-place
    # (start is a multiple of 128 -> aligned, unmasked vector loads).
    start = pl.multiple_of(k * tk, 128)
    x_tile = x_ref[:, pl.ds(start, tk)]

    # bf16 x bf16 -> f32 accumulate on the MXU.
    acc_ref[...] += jnp.dot(x_tile, w_ref[...],
                            preferred_element_type=jnp.float32)

    @pl.when(k == pl.num_programs(0) - 1)
    def _():
        # encodings: rows [0, B) = src images, rows [B, 2B) = target images,
        # remaining rows are zero padding (ignored).
        enc = acc_ref[...] + bias_ref[...]                     # [M_pad, D] f32
        src = enc[0:batch, :]                                  # [B, D]
        tgt = enc[batch:2 * batch, :]                          # [B, D]

        eps = jnp.float32(1e-12)   # guard rsqrt(0) -> NaN (mirrors F.normalize eps)
        src_n = src * lax.rsqrt(jnp.sum(src * src, axis=-1, keepdims=True) + eps)
        tgt_n = tgt * lax.rsqrt(jnp.sum(tgt * tgt, axis=-1, keepdims=True) + eps)
        edit = tgt_n - src_n
        edit = edit * lax.rsqrt(jnp.sum(edit * edit, axis=-1, keepdims=True) + eps)

        # edit and tdir are unit-norm, so CosineSimilarity reduces to the dot
        # product (the |x||y| terms are identically 1; eps clamp is a no-op).
        cos = jnp.sum(edit * tdir_ref[...], axis=-1, keepdims=True)   # [B, 1]
        loss_ref[...] = jnp.mean(1.0 - cos, keepdims=True)            # [1, 1]


def fused_clip_directional_loss(x_pad, w_pad, bias, tdir, *, batch, tk):
    """x_pad: [M_pad, F_pad] bf16 (resident), w_pad: [F_pad, D] bf16 (streamed),
    bias/tdir: [1, D] f32."""
    m_pad, f_pad = x_pad.shape
    _, d = w_pad.shape
    num_k = f_pad // tk

    kernel = functools.partial(_fused_clip_direction_kernel, batch=batch, tk=tk)
    out = pl.pallas_call(
        kernel,
        out_shape=jax.ShapeDtypeStruct((1, 1), jnp.float32),
        grid_spec=pltpu.PrefetchScalarGridSpec(
            num_scalar_prefetch=0,
            grid=(num_k,),
            in_specs=[
                # x: whole array, constant index_map -> resident, no per-step DMA
                pl.BlockSpec((m_pad, f_pad), lambda k: (0, 0)),
                # w: the only streamed operand, double-buffered by BlockSpec
                pl.BlockSpec((tk, d), lambda k: (k, 0)),
                pl.BlockSpec((1, d), lambda k: (0, 0)),        # bias (resident)
                pl.BlockSpec((1, d), lambda k: (0, 0)),        # text direction
            ],
            out_specs=pl.BlockSpec((1, 1), lambda k: (0, 0)),
            scratch_shapes=[pltpu.VMEM((m_pad, d), jnp.float32)],
        ),
        compiler_params=pltpu.CompilerParams(
            dimension_semantics=("arbitrary",),
            # 48 MiB: big enough for 2x ~8 MiB w buffers + resident x, still
            # leaves headroom under v7x's 64 MiB physical VMEM.
            vmem_limit_bytes=48 * 1024 * 1024,
        ),
    )(x_pad, w_pad, bias, tdir)
    return out[0, 0]


# ---------------------------------------------------------------------------
# Glue (parameter setup, synthetic text features)
# ---------------------------------------------------------------------------
def compute_text_direction(key, num_templates, embed_dim):
    # synthetic encode_text(templates) for source/target classes; mirrors the
    # normalize / mean / normalize chain of clip_directional_loss.
    k1, k2 = jax.random.split(key)
    src_feat = jax.random.normal(k1, (num_templates, embed_dim), jnp.float32)
    tgt_feat = jax.random.normal(k2, (num_templates, embed_dim), jnp.float32)
    src_feat = src_feat / jnp.linalg.norm(src_feat, axis=-1, keepdims=True)
    tgt_feat = tgt_feat / jnp.linalg.norm(tgt_feat, axis=-1, keepdims=True)
    d = jnp.mean(tgt_feat - src_feat, axis=0, keepdims=True)
    d = d / jnp.linalg.norm(d, axis=-1, keepdims=True)
    return d                                             # [1, D]


class CLIPLossPallas:
    def __init__(self, key, img_shape, lambda_direction=1.0, max_tk=8192):
        B, C, H, W = img_shape
        self.lambda_direction = lambda_direction
        self.B = B
        self.F = C * H * W

        kw, kt = jax.random.split(key)
        # deterministic synthetic "image encoder" projection weight
        w = jax.random.normal(kw, (self.F, EMBED_DIM), jnp.float32) / jnp.sqrt(
            jnp.float32(self.F))

        # Fold preprocess:  ((x+1)/2 - mean_c)/std_c  ==  x*scale_c + shift_c
        mean = jnp.array(CLIP_MEAN[:C], jnp.float32)
        std = jnp.array(CLIP_STD[:C], jnp.float32)
        scale_c = 0.5 / std
        shift_c = (0.5 - mean) / std
        scale = jnp.repeat(scale_c, H * W)                 # [F] channel-major
        shift = jnp.repeat(shift_c, H * W)                 # [F]
        w_scaled = w * scale[:, None]                      # [F, D]
        self.bias = (shift[None, :] @ w).astype(jnp.float32)   # [1, D]

        # K tiling / padding.  f_pad is F rounded up to 128; tk is the largest
        # multiple-of-128 divisor of f_pad <= max_tk, so w has AT MOST 127
        # padded columns (and for 224x224x3 inputs, exactly zero).
        self.f_pad = _round_up(self.F, 128)
        self.tk = _choose_tk(self.f_pad, max_tk)
        # M padded to 16: bf16 vregs pack [16,128] sublanes -> unmasked loads.
        self.m_pad = max(16, _round_up(2 * B, 16))
        w_pad = jnp.zeros((self.f_pad, EMBED_DIM), jnp.float32)
        w_pad = w_pad.at[:self.F].set(w_scaled)
        self.w_bf16 = w_pad.astype(jnp.bfloat16)

        # cached target_direction (computed once, as in the PyTorch module)
        self.target_direction = compute_text_direction(kt, NUM_TEMPLATES, EMBED_DIM)

    def __call__(self, src_img, target_img):
        loss = jnp.float32(0.0)
        if self.lambda_direction:
            B, F = self.B, self.F
            x = jnp.concatenate(
                [src_img.reshape(B, F), target_img.reshape(B, F)], axis=0)
            x = jnp.pad(x.astype(jnp.float32),
                        ((0, self.m_pad - 2 * B), (0, self.f_pad - F)))
            x = x.astype(jnp.bfloat16)
            loss = loss + self.lambda_direction * fused_clip_directional_loss(
                x, self.w_bf16, self.bias, self.target_direction,
                batch=B, tk=self.tk)
        # TODO(synk): lambda_global / lambda_patch / lambda_manifold /
        # lambda_texture branches require the full CLIP / RN50 encoders and
        # are not implemented.
        return loss


if __name__ == "__main__":
    key = jax.random.PRNGKey(0)
    k_src, k_tgt, k_params = jax.random.split(key, 3)

    B, C, H, W = 2, 3, 16, 16
    # images in [-1, 1] as the module's preprocess expects
    src_img = jax.random.uniform(k_src, (B, C, H, W), jnp.float32, -1.0, 1.0)
    target_img = jax.random.uniform(k_tgt, (B, C, H, W), jnp.float32, -1.0, 1.0)

    # max_tk=256 -> tk=256, 3 K-steps on the toy F=768 (F_pad divisible by tk),
    # exercising the pipelined grid + in-kernel x slicing.
    loss_mod = CLIPLossPallas(k_params, (B, C, H, W), lambda_direction=1.0,
                              max_tk=256)
    loss = loss_mod(src_img, target_img)
    jax.block_until_ready(loss)
    print("KERNEL_OK")
</pallas_src>

<mosaic_0001>
module attributes {stable_mosaic.version = 11 : i64} {
  func.func @_fused_clip_direction_kernel(%arg0: i32, %arg1: memref<16x768xbf16, #tpu.memory_space<vmem>>, %arg2: memref<256x512xbf16, #tpu.memory_space<vmem>>, %arg3: memref<1x512xf32, #tpu.memory_space<vmem>>, %arg4: memref<1x512xf32, #tpu.memory_space<vmem>>, %arg5: memref<1x1xf32, #tpu.memory_space<vmem>>, %arg6: memref<16x512xf32, #tpu.memory_space<vmem>>) attributes {dimension_semantics = [#tpu.dimension_semantics<arbitrary>], iteration_bounds = array<i64: 3>, scalar_prefetch = 0 : i64, scratch_operands = 1 : i64, tpu.core_type = #tpu.core_type<tc>, window_params = [{pipeline_mode = #tpu.pipeline_mode<synchronous>, transform_indices = @transform_0, window_bounds = array<i64: 16, 768>}, {transform_indices = @transform_1, window_bounds = array<i64: 256, 512>}, {pipeline_mode = #tpu.pipeline_mode<synchronous>, transform_indices = @transform_2, window_bounds = array<i64: 1, 512>}, {pipeline_mode = #tpu.pipeline_mode<synchronous>, transform_indices = @transform_3, window_bounds = array<i64: 1, 512>}, {pipeline_mode = #tpu.pipeline_mode<synchronous>, transform_indices = @transform_4, window_bounds = array<i64: 1, 1>}]} {
    %c0_i32 = arith.constant 0 : i32
    %0 = arith.cmpi eq, %arg0, %c0_i32 : i32
    %1 = arith.extui %0 : i1 to i32
    %c0_i32_0 = arith.constant 0 : i32
    %2 = arith.cmpi ne, %1, %c0_i32_0 : i32
    scf.if %2 {
      %cst_8 = arith.constant 0.000000e+00 : f32
      %15 = vector.broadcast %cst_8 : f32 to vector<16x512xf32>
      %c0_9 = arith.constant 0 : index
      %c0_10 = arith.constant 0 : index
      %16 = vector.load %arg6[%c0_9, %c0_10] : memref<16x512xf32, #tpu.memory_space<vmem>>, vector<16x512xf32>
      tpu.vector_store %arg6[%c0_9, %c0_10], %15 {strides = array<i32>} : memref<16x512xf32, #tpu.memory_space<vmem>>, vector<16x512xf32>,
    } else {
    }
    %c256_i32 = arith.constant 256 : i32
    %3 = arith.muli %arg0, %c256_i32 : i32
    %4 = tpu.assume_multiple %3, 128 : i32
    %c0 = arith.constant 0 : index
    %5 = arith.index_cast %4 : i32 to index
    %6 = vector.load %arg1[%c0, %5] : memref<16x768xbf16, #tpu.memory_space<vmem>>, vector<16x256xbf16>
    %c0_1 = arith.constant 0 : index
    %c0_2 = arith.constant 0 : index
    %7 = vector.load %arg6[%c0_1, %c0_2] : memref<16x512xf32, #tpu.memory_space<vmem>>, vector<16x512xf32>
    %c0_3 = arith.constant 0 : index
    %c0_4 = arith.constant 0 : index
    %8 = vector.load %arg2[%c0_3, %c0_4] : memref<256x512xbf16, #tpu.memory_space<vmem>>, vector<256x512xbf16>
    %cst = arith.constant dense<0.000000e+00> : vector<16x512xf32>
    %9 = tpu.matmul %6, %8, %cst {dimension_numbers = #tpu.dot_dimension_numbers<[1], [0], [0], [1], [0, 0, 1, 1], [], []>} : vector<16x256xbf16>, vector<256x512xbf16>, vector<16x512xf32> -> vector<16x512xf32>
    %10 = arith.addf %7, %9 : vector<16x512xf32>
    %c0_5 = arith.constant 0 : index
    %c0_6 = arith.constant 0 : index
    %11 = vector.load %arg6[%c0_5, %c0_6] : memref<16x512xf32, #tpu.memory_space<vmem>>, vector<16x512xf32>
    tpu.vector_store %arg6[%c0_5, %c0_6], %10 {strides = array<i32>} : memref<16x512xf32, #tpu.memory_space<vmem>>, vector<16x512xf32>,
    %c2_i32 = arith.constant 2 : i32
    %12 = arith.cmpi eq, %arg0, %c2_i32 : i32
    %13 = arith.extui %12 : i1 to i32
    %c0_i32_7 = arith.constant 0 : i32
    %14 = arith.cmpi ne, %13, %c0_i32_7 : i32
    scf.if %14 {
      %c0_8 = arith.constant 0 : index
      %c0_9 = arith.constant 0 : index
      %15 = vector.load %arg6[%c0_8, %c0_9] : memref<16x512xf32, #tpu.memory_space<vmem>>, vector<16x512xf32>
      %c0_10 = arith.constant 0 : index
      %c0_11 = arith.constant 0 : index
      %16 = vector.load %arg3[%c0_10, %c0_11] : memref<1x512xf32, #tpu.memory_space<vmem>>, vector<1x512xf32>
      %17 = vector.broadcast %16 : vector<1x512xf32> to vector<16x512xf32>
      %18 = arith.addf %15, %17 : vector<16x512xf32>
      %19 = vector.extract_strided_slice %18 {offsets = [0, 0], sizes = [2, 512], strides = [1, 1]} : vector<16x512xf32> to vector<2x512xf32>
      %20 = vector.extract_strided_slice %18 {offsets = [2, 0], sizes = [2, 512], strides = [1, 1]} : vector<16x512xf32> to vector<2x512xf32>
      %21 = arith.mulf %19, %19 : vector<2x512xf32>
      %cst_12 = arith.constant dense<0.000000e+00> : vector<2xf32>
      %22 = vector.multi_reduction <add>, %21, %cst_12 [1] : vector<2x512xf32> to vector<2xf32>
      %23 = vector.shape_cast %22 : vector<2xf32> to vector<2x1xf32>
      %cst_13 = arith.constant 9.99999996E-13 : f32
      %24 = vector.broadcast %cst_13 : f32 to vector<2x1xf32>
      %25 = arith.addf %23, %24 : vector<2x1xf32>
      %26 = math.rsqrt %25 : vector<2x1xf32>
      %27 = vector.broadcast %26 : vector<2x1xf32> to vector<2x512xf32>
      %28 = arith.mulf %19, %27 : vector<2x512xf32>
      %29 = arith.mulf %20, %20 : vector<2x512xf32>
      %cst_14 = arith.constant dense<0.000000e+00> : vector<2xf32>
      %30 = vector.multi_reduction <add>, %29, %cst_14 [1] : vector<2x512xf32> to vector<2xf32>
      %31 = vector.shape_cast %30 : vector<2xf32> to vector<2x1xf32>
      %cst_15 = arith.constant 9.99999996E-13 : f32
      %32 = vector.broadcast %cst_15 : f32 to vector<2x1xf32>
      %33 = arith.addf %31, %32 : vector<2x1xf32>
      %34 = math.rsqrt %33 : vector<2x1xf32>
      %35 = vector.broadcast %34 : vector<2x1xf32> to vector<2x512xf32>
      %36 = arith.mulf %20, %35 : vector<2x512xf32>
      %37 = arith.subf %36, %28 : vector<2x512xf32>
      %38 = arith.mulf %37, %37 : vector<2x512xf32>
      %cst_16 = arith.constant dense<0.000000e+00> : vector<2xf32>
      %39 = vector.multi_reduction <add>, %38, %cst_16 [1] : vector<2x512xf32> to vector<2xf32>
      %40 = vector.shape_cast %39 : vector<2xf32> to vector<2x1xf32>
      %cst_17 = arith.constant 9.99999996E-13 : f32
      %41 = vector.broadcast %cst_17 : f32 to vector<2x1xf32>
      %42 = arith.addf %40, %41 : vector<2x1xf32>
      %43 = math.rsqrt %42 : vector<2x1xf32>
      %44 = vector.broadcast %43 : vector<2x1xf32> to vector<2x512xf32>
      %45 = arith.mulf %37, %44 : vector<2x512xf32>
      %c0_18 = arith.constant 0 : index
      %c0_19 = arith.constant 0 : index
      %46 = vector.load %arg4[%c0_18, %c0_19] : memref<1x512xf32, #tpu.memory_space<vmem>>, vector<1x512xf32>
      %47 = vector.broadcast %46 : vector<1x512xf32> to vector<2x512xf32>
      %48 = arith.mulf %45, %47 : vector<2x512xf32>
      %cst_20 = arith.constant dense<0.000000e+00> : vector<2xf32>
      %49 = vector.multi_reduction <add>, %48, %cst_20 [1] : vector<2x512xf32> to vector<2xf32>
      %50 = vector.shape_cast %49 : vector<2xf32> to vector<2x1xf32>
      %cst_21 = arith.constant 1.000000e+00 : f32
      %51 = vector.broadcast %cst_21 : f32 to vector<2x1xf32>
      %52 = arith.subf %51, %50 : vector<2x1xf32>
      %53 = vector.shape_cast %52 : vector<2x1xf32> to vector<1x2x1xf32>
      %cst_22 = arith.constant dense<0.000000e+00> : vector<1xf32>
      %54 = vector.multi_reduction <add>, %53, %cst_22 [1, 2] : vector<1x2x1xf32> to vector<1xf32>
      %55 = vector.shape_cast %54 : vector<1xf32> to vector<1x1x1xf32>
      %56 = vector.extract %55[0, 0, 0] : f32 from vector<1x1x1xf32>
      %57 = vector.broadcast %56 : f32 to vector<1x1xf32>
      %cst_23 = arith.constant 2.000000e+00 : f32
      %58 = vector.broadcast %cst_23 : f32 to vector<1x1xf32>
      %59 = arith.divf %57, %58 : vector<1x1xf32>
      %c0_24 = arith.constant 0 : index
      %c0_25 = arith.constant 0 : index
      %60 = vector.load %arg5[%c0_24, %c0_25] : memref<1x1xf32, #tpu.memory_space<vmem>>, vector<1x1xf32>
      tpu.vector_store %arg5[%c0_24, %c0_25], %59 {strides = array<i32>} : memref<1x1xf32, #tpu.memory_space<vmem>>, vector<1x1xf32>,
    } else {
    }
    return
  }
  func.func @transform_0(%arg0: i32) -> (i32, i32) {
    %c0_i32 = arith.constant 0 : i32
    %c0_i32_0 = arith.constant 0 : i32
    %c0_i32_1 = arith.constant 0 : i32
    return %c0_i32, %c0_i32_0 : i32, i32
  }
  func.func @transform_1(%arg0: i32) -> (i32, i32) {
    %c0_i32 = arith.constant 0 : i32
    %c0_i32_0 = arith.constant 0 : i32
    return %arg0, %c0_i32 : i32, i32
  }
  func.func @transform_2(%arg0: i32) -> (i32, i32) {
    %c0_i32 = arith.constant 0 : i32
    %c0_i32_0 = arith.constant 0 : i32
    %c0_i32_1 = arith.constant 0 : i32
    return %c0_i32, %c0_i32_0 : i32, i32
  }
  func.func @transform_3(%arg0: i32) -> (i32, i32) {
    %c0_i32 = arith.constant 0 : i32
    %c0_i32_0 = arith.constant 0 : i32
    %c0_i32_1 = arith.constant 0 : i32
    return %c0_i32, %c0_i32_0 : i32, i32
  }
  func.func @transform_4(%arg0: i32) -> (i32, i32) {
    %c0_i32 = arith.constant 0 : i32
    %c0_i32_0 = arith.constant 0 : i32
    %c0_i32_1 = arith.constant 0 : i32
    return %c0_i32, %c0_i32_0 : i32, i32
  }
}

</mosaic_0001>

<bundles_post_ra>
// kernel: tpu_custom_call.1
= control target key start
LH: loop header
LB: loop body
LE: loop exit
PB: predicated region body
PF: predicated region fallthrough
CT: control target
= control target key end

     0   :  { %9 = vsyncpa [#allocation4], 0  ;;  %s1718_s0 = inlined_call_operand.hbm [shape: bf16[16,768], index: 0, kind: input, shape index: {}]   ;;  %s1719_s1 = inlined_call_operand.hbm [shape: bf16[768,512], index: 1, kind: input, shape index: {}]   ;;  %s1720_s2 = inlined_call_operand.hbm [shape: f32[1,512], index: 2, kind: input, shape index: {}]   ;;  %s1721_s3 = inlined_call_operand.vmem [shape: f32[1,512], index: 3, kind: input, shape index: {}]   ;;  %s1722_s4 = inlined_call_operand.hbm [shape: f32[1,1], index: 4, kind: output, shape index: {}]  }
   0x1   :  { %10 = vsyncpa [#allocation7], 0 }
   0x2   :  { %12 = vsyncpa [#allocation7 + $0x1], 0 }
   0x3   :  { %13 = vsyncpa [#allocation5], 0  ;;  %s1450_s15 = smov 0   ;;  %s1452_s16 = smov 0  }
   0x4   :  { %s1454_s17 = smov 0   ;;  %s1456_s18 = smov 0  }
   0x5 LB: > { %s1469_s19 = sadd.s32 4294967295, %s1414_s18   ;;  %s1472_s20 = sadd.s32 1, %s1414_s18   ;;  %s1414_s18 = sphi %s1456_s18, %s1743_s18   ;;  %s1410_s17 = sphi %s1454_s17, %s1742_s17   ;;  %s1406_s16 = sphi %s1452_s16, %s1741_s16   ;;  %s1402_s15 = sphi %s1450_s15, %s1740_s15  }
   0x6   : > { %s44_s21 = ssub.s32 %s1414_s18, %s1472_s20  ;;  %s47_s22 = sadd.s32 1, %s1410_s17 }
   0x7   : > { %p45_p0 = scmp.eq.s32.totalorder %s44_s21, 0  ;;  %p54_p1 = scmp.ne.s32.totalorder %s1410_s17, %s1406_s16 }
   0x8   : > { %p55_p2 = scmp.eq.s32.totalorder %s1414_s18, 0  ;;  %p60_p3 = scmp.ne.s32.totalorder %s1406_s16, %s1402_s15 }
   0x9   : > { %s1482_s23 = scalar_select %p45_p0, %s1410_s17, %s47_s22  }
   0xa   : > { %p1484_p4 = por %p55_p2, %p54_p1  ;;  %p1723_p5 = scmp.eq.s32.totalorder %s1469_s19, 0 }
   0xb   : > { %p997_p6 = scmp.ge.s32.totalorder %s1414_s18, 1  ;;  %p134_p7 = scmp.lt.s32.totalorder %s1414_s18, 4 }
   0xc   : > { %p1493_p8 = por %p1723_p5, %p60_p3  ;;  %s1416_s27 = smov [#allocation8]  }
   0xd   : > { %p1498_p10 = pnand %p997_p6, %p134_p7  ;;  %s160_s28 = sshll.u32 %s1416_s27, 4  ;;  %s161_s28 = int_to_ptr.vmem [resolvable:$true] %s160_s28 }
   0xe   : > { %s1728_s25 = scalar_select %p1493_p8, 1, 0 }
   0xf   : > { %s1729_s26 = scalar_select %p1498_p10, 1, 0 }
  0x10   : > { %p1101_p11 = pneg %p1498_p10  ;;  %p1114_p12 = scmp.lt.s32.totalorder %s1414_s18, 3 }
  0x11   : > { %s1417_s30 = smov [#allocation3]   ;;  %s1275_s7 = scalar_lea.vmem %s161_s28, 64 }
  0x12   : > { %p1507_p13 = pnand %p1101_p11, %p1723_p5  ;;  %s146_s5 = sshll.u32 %s1417_s30, 4  ;;  %s147_s5 = int_to_ptr.vmem [resolvable:$true] %s146_s5 }
  0x13   : > { %p1513_p0 = pnand %p1114_p12, %p1484_p4  ;;  %p1276_p2 = scmp.ne.s32.totalorder %s161_s28, %s1275_s7 }
  0x14   : > { %p1266_p1 = pneg %p1507_p13  ;;  %p1283_p7 = scmp.lt.s32.totalorder %s161_s28, %s161_s28 }
  0x15   : > { %s1731_s6 = scalar_select %p1513_p0, 1, 0 }
  0x16   : > { %p1278_p3 = pnand %p1276_p2, %p1266_p1  ;;  %p1284_p11 = scmp.lt.s32.totalorder %s1275_s7, %s1275_s7 }
  0x18   : > { %p1279_p6 = pneg %p1278_p3  ;;  %p1285_p9 = por %p1284_p11, %p1283_p7 }
  0x1a   : > { %p1286_p5 = pnand %p1285_p9, %p1279_p6 }
  0x1c   : > { %1289 = shalt.err (!%p1286_p5)
}
  0x1d   : > { %1107 = dma.hbm_to_vmem [thread:$0]  (!%p1507_p13), %s1720_s2, 64, %s161_s28, [#allocation7]  }
  0x1e   : > { %s1301_s10 = scalar_lea.vmem %s147_s5, 768  ;;  %p1309_p2 = scmp.lt.s32.totalorder %s147_s5, %s147_s5 }
  0x1f   : > { %p1302_p4 = scmp.ne.s32.totalorder %s147_s5, %s1301_s10  ;;  %p1310_p3 = scmp.lt.s32.totalorder %s1301_s10, %s1301_s10 }
  0x21   : > { %p1304_p12 = pnand %p1302_p4, %p1266_p1  ;;  %p1311_p10 = por %p1310_p3, %p1309_p2 }
  0x23   : > { %p1305_p8 = pneg %p1304_p12 }
  0x25   : > { %p1312_p0 = pnand %p1311_p10, %p1305_p8 }
  0x27   : > { %1315 = shalt.err (!%p1312_p0)
}
  0x28   : > { %s1418_s11 = smov 384   ;;  %s1419_s12 = smov 24  }
  0x29   : > { %1104 = dma.hbm_to_vmem [thread:$0]  (!%p1507_p13), %s1718_s0, 768, %s147_s5, [#allocation4], %s1418_s11, %s1418_s11, %s1419_s12  }
  0x2a   : > { %s174_s15 = sand.u32 1, %s1414_s18   ;;  %s176_s21 = sand.u32 1, %s1410_s17  }
  0x2b   : > { %s1001_s22 = sshll.u32 %s176_s21, 9  ;;  %s1084_s24 = sshll.u32 %s1414_s18, 13 }
  0x2c   : > { %s1541_s30 = scalar_lea.hbm %s1719_s1, %s1084_s24  ;;  %s178_s7 = scalar_lea.vmem [#allocation6], %s1001_s22 }
  0x2d   : > { %s186_s8 = sshll.u32 %s178_s7, 4  ;;  %s1545_s29 = scalar_lea.sflag [#allocation7], %s174_s15  ;;  %s1543_s8 = int_to_ptr.vmem [resolvable:$true] %s186_s8 }
  0x2e   : > { %s1316_s9 = scalar_lea.hbm %s1541_s30, 8192  ;;  %p1732_p8 = scmp.ne.s32.totalorder %s1731_s6, 0 }
  0x2f   : > { %p1317_p5 = scmp.ne.s32.totalorder %s1541_s30, %s1316_s9  ;;  %s1321_s10 = scalar_lea.hbm %s1719_s1, 24576 }
  0x30   : > { %p1318_p9 = pneg %p1732_p8  ;;  %p1322_p0 = scmp.lt.s32.totalorder %s1541_s30, %s1719_s1 }
  0x31   : > { %p1323_p1 = scmp.lt.s32.totalorder %s1321_s10, %s1316_s9 }
  0x32   : > { %p1319_p10 = pnand %p1318_p9, %p1317_p5 }
  0x33   : > { %p1324_p6 = por %p1323_p1, %p1322_p0 }
  0x34   : > { %p1320_p13 = pneg %p1319_p10 }
  0x36   : > { %p1325_p7 = pnand %p1324_p6, %p1320_p13 }
  0x38   : > { %1328 = shalt.err (!%p1325_p7)
}
  0x39   : > { %s1329_s13 = scalar_lea.vmem %s1543_s8, 8192  ;;  %s1420_s14 = smov [#allocation6]  }
  0x3a   : > { %p1330_p11 = scmp.ne.s32.totalorder %s1543_s8, %s1329_s13  ;;  %s1334_s15 = sshll.u32 %s1420_s14, 4  ;;  %s1335_s15 = int_to_ptr.vmem [resolvable:$false] %s1334_s15 }
  0x3b   : > { %s1336_s21 = scalar_lea.vmem %s1335_s15, 16384  ;;  %p1337_p2 = scmp.lt.s32.totalorder %s1543_s8, %s1335_s15 }
  0x3c   : > { %p1332_p4 = pnand %p1330_p11, %p1318_p9  ;;  %p1338_p3 = scmp.lt.s32.totalorder %s1336_s21, %s1329_s13 }
  0x3e   : > { %p1333_p12 = pneg %p1332_p4  ;;  %p1339_p5 = por %p1338_p3, %p1337_p2 }
  0x40   : > { %p1340_p10 = pnand %p1339_p5, %p1333_p12 }
  0x42   : > { %1343 = shalt.err (!%p1340_p10)
}
  0x43   : > { %s1421_s22 = smov 256   ;;  %s1422_s24 = smov 16  }
  0x44   : > { %1111 = dma.hbm_to_vmem [thread:$0]  (!%p1732_p8), %s1541_s30, 8192, %s1543_s8, %s1545_s29, %s1421_s22, %s1421_s22, %s1422_s24  }
  0x45   : > { %p1733_p9 = scmp.ne.s32.totalorder %s1729_s26, 0 }
  0x46   : > { %p1734_p13 = scmp.eq.s32.totalorder (!%p1733_p9), %s1469_s19, 0 }
  0x47   : > { %198 = sbr.rel (%p1733_p9) target bundleno = 1081 (0x439), region = 36 }
  0x4c   : > { %1385 = dma.done.wait (%p1734_p13), [#allocation4], 768   ;;  %p1735_p0 = pmov %p1734_p13 }
  0x4d   : > { %s204_s27 = sand.u32 1, %s1469_s19   ;;  %s206_s28 = sand.u32 1, %s1406_s16  }
  0x4e   : > { %1387 = vsyncadd (%p1735_p0), [#allocation4], 4294966528  ;;  %s1007_s7 = sshll.u32 %s206_s28, 9  ;;  %s205_s9 = scalar_lea.sflag [#allocation7], %s204_s27 }
  0x4f   : > { %s1574_s18 = scalar_lea.vmem [#allocation6], %s1007_s7  ;;  %p1736_p1 = scmp.ne.s32.totalorder %s1728_s25, 0 }
  0x51   : > { %1389 = dma.done.wait (%p1736_p1), %s205_s9, 8192  }
  0x52   : > { %1391 = vsyncadd (%p1736_p1), %s205_s9, 4294959104  ;;  %p1737_p8 = pmov %p1735_p0 }
  0x53   : > { %p1738_p6 = pmov %p1735_p0 }
  0x54   : > { %1393 = dma.done.wait (%p1737_p8), [#allocation7], 64  }
  0x55   : > { %1395 = vsyncadd (%p1738_p6), [#allocation7], 4294967232  ;;  %p1739_p7 = scmp.ne.s32.totalorder %s1469_s19, 0 }
  0x57   : > { %236 = sbr.rel (%p1739_p7) target bundleno = 97 (0x61), region = 52 }
  0x5c   : > { %v1423_v0 = vmov 0.0  }
  0x5d   : > { %237 = vst [vmem:[#allocation2 + $0x30] sm:$0xff] %v1423_v0  ;;  %238 = vst [vmem:[#allocation2] sm:$0xff] %v1423_v0 }
  0x5e   : > { %239 = vst [vmem:[#allocation2 + $0x18] sm:$0xff] %v1423_v0  ;;  %240 = vst [vmem:[#allocation2 + $0x10] sm:$0xff] %v1423_v0 }
  0x5f   : > { %241 = vst [vmem:[#allocation2 + $0x8] sm:$0xff] %v1423_v0  ;;  %242 = vst [vmem:[#allocation2 + $0x20] sm:$0xff] %v1423_v0 }
  0x60   : > { %243 = vst [vmem:[#allocation2 + $0x28] sm:$0xff] %v1423_v0  ;;  %244 = vst [vmem:[#allocation2 + $0x38] sm:$0xff] %v1423_v0 }
  0x61 PF: > { %v1159_v1 = vld [vmem:[%s1574_s18 + $0xe4] ss:$16 sps:$4 sm:$0xff]   ;;  %v1161_v2 = vld [vmem:[%s1574_s18 + $0xec] ss:$16 sps:$4 sm:$0xff]   ;;  %v1163_v3 = vld [vmem:[%s1574_s18 + $0xe0] ss:$16 sps:$4 sm:$0xff]  }
  0x62   : > { %654 = vmatprep.subr.bf16.mxu0 %v1159_v1  ;;  %v1164_v4 = vld [vmem:[%s1574_s18 + $0xe8] ss:$16 sps:$4 sm:$0xff]   ;;  %697 = vmatprep.subr.bf16.mxu1 %v1161_v2  ;;  %v1165_v5 = vld [vmem:[%s1574_s18 + $0xc4] ss:$16 sps:$4 sm:$0xff]   ;;  %v1167_v6 = vld [vmem:[%s1574_s18 + $0xcc] ss:$16 sps:$4 sm:$0xff]  }
  0x63   : > { %655 = vmatpush1.bf16.msra.mxu0 %v1163_v3  ;;  %698 = vmatpush1.bf16.msra.mxu1 %v1164_v4  ;;  %v1169_v7 = vld [vmem:[%s1574_s18 + $0xc0] ss:$16 sps:$4 sm:$0xff]   ;;  %v1170_v8 = vld [vmem:[%s1574_s18 + $0xc8] ss:$16 sps:$4 sm:$0xff]   ;;  %v1171_v9 = vld [vmem:[%s1574_s18 + $0xa4] ss:$16 sps:$4 sm:$0xff]  }
  0x64   : > { %656 = vmatprep.subr.bf16.mxu0 %v1165_v5  ;;  %699 = vmatprep.subr.bf16.mxu1 %v1167_v6  ;;  %v1173_v10 = vld [vmem:[%s1574_s18 + $0xac] ss:$16 sps:$4 sm:$0xff]   ;;  %v1175_v11 = vld [vmem:[%s1574_s18 + $0xa0] ss:$16 sps:$4 sm:$0xff]   ;;  %v1176_v12 = vld [vmem:[%s1574_s18 + $0xa8] ss:$16 sps:$4 sm:$0xff]  }
  0x65   : > { %v1177_v13 = vld [vmem:[%s1574_s18 + $0x84] ss:$16 sps:$4 sm:$0xff]   ;;  %v1179_v14 = vld [vmem:[%s1574_s18 + $0x8c] ss:$16 sps:$4 sm:$0xff]   ;;  %v1181_v15 = vld [vmem:[%s1574_s18 + $0x80] ss:$16 sps:$4 sm:$0xff]  }
  0x66   : > { %v1182_v16 = vld [vmem:[%s1574_s18 + $0x88] ss:$16 sps:$4 sm:$0xff]   ;;  %v1183_v17 = vld [vmem:[%s1574_s18 + $0x64] ss:$16 sps:$4 sm:$0xff]   ;;  %v1185_v18 = vld [vmem:[%s1574_s18 + $0x6c] ss:$16 sps:$4 sm:$0xff]  }
  0x67   : > { %657 = vmatpush1.bf16.msra.mxu0 %v1169_v7  ;;  %700 = vmatpush1.bf16.msra.mxu1 %v1170_v8  ;;  %v1187_v19 = vld [vmem:[%s1574_s18 + $0x60] ss:$16 sps:$4 sm:$0xff]   ;;  %v1188_v20 = vld [vmem:[%s1574_s18 + $0x68] ss:$16 sps:$4 sm:$0xff]   ;;  %v1189_v21 = vld [vmem:[%s1574_s18 + $0x44] ss:$16 sps:$4 sm:$0xff]  }
  0x68   : > { %658 = vmatprep.subr.bf16.mxu0 %v1171_v9  ;;  %701 = vmatprep.subr.bf16.mxu1 %v1173_v10  ;;  %v1191_v22 = vld [vmem:[%s1574_s18 + $0x4c] ss:$16 sps:$4 sm:$0xff]   ;;  %v1193_v23 = vld [vmem:[%s1574_s18 + $0x40] ss:$16 sps:$4 sm:$0xff]   ;;  %v1194_v24 = vld [vmem:[%s1574_s18 + $0x48] ss:$16 sps:$4 sm:$0xff]  }
  0x69   : > { %v1195_v25 = vld [vmem:[%s1574_s18 + $0x24] ss:$16 sps:$4 sm:$0xff]   ;;  %v1197_v26 = vld [vmem:[%s1574_s18 + $0x2c] ss:$16 sps:$4 sm:$0xff]   ;;  %v1199_v27 = vld [vmem:[%s1574_s18 + $0x20] ss:$16 sps:$4 sm:$0xff]  }
  0x6a   : > { %v1200_v28 = vld [vmem:[%s1574_s18 + $0x28] ss:$16 sps:$4 sm:$0xff]   ;;  %v1201_v29 = vld [vmem:[%s1574_s18 + $0x4] ss:$16 sps:$4 sm:$0xff]   ;;  %v1203_v30 = vld [vmem:[%s1574_s18 + $0xc] ss:$16 sps:$4 sm:$0xff]  }
  0x6b   : > { %659 = vmatpush1.bf16.msra.mxu0 %v1175_v11  ;;  %702 = vmatpush1.bf16.msra.mxu1 %v1176_v12  ;;  %v1205_v31 = vld [vmem:[%s1574_s18] ss:$16 sps:$4 sm:$0xff]   ;;  %v1206_v32 = vld [vmem:[%s1574_s18 + $0x8] ss:$16 sps:$4 sm:$0xff]   ;;  %v1207_v33 = vld [vmem:[%s1574_s18 + $0x1e4] ss:$16 sps:$4 sm:$0xff]  }
  0x6c   : > { %660 = vmatprep.subr.bf16.mxu0 %v1177_v13  ;;  %703 = vmatprep.subr.bf16.mxu1 %v1179_v14  ;;  %v1209_v34 = vld [vmem:[%s1574_s18 + $0x1ec] ss:$16 sps:$4 sm:$0xff]   ;;  %v1211_v35 = vld [vmem:[%s1574_s18 + $0x1e0] ss:$16 sps:$4 sm:$0xff]   ;;  %v1212_v36 = vld [vmem:[%s1574_s18 + $0x1e8] ss:$16 sps:$4 sm:$0xff]  }
  0x6d   : > { %s1010_s25 = sshll.u32 %s1469_s19, 8  ;;  %v1213_v37 = vld [vmem:[%s1574_s18 + $0x1c4] ss:$16 sps:$4 sm:$0xff]   ;;  %v1215_v38 = vld [vmem:[%s1574_s18 + $0x1cc] ss:$16 sps:$4 sm:$0xff]   ;;  %p1078_p11 = scmp.ne.s32.totalorder %s1469_s19, 2 }
  0x6e   : > { %s246_s26 = sshra.s32 %s1010_s25, 7  ;;  %v1217_v39 = vld [vmem:[%s1574_s18 + $0x1c0] ss:$16 sps:$4 sm:$0xff]   ;;  %v1218_v40 = vld [vmem:[%s1574_s18 + $0x1c8] ss:$16 sps:$4 sm:$0xff]  }
  0x6f   : > { %661 = vmatpush1.bf16.msra.mxu0 %v1181_v15  ;;  %704 = vmatpush1.bf16.msra.mxu1 %v1182_v16  ;;  %v1219_v41 = vld [vmem:[%s1574_s18 + $0x1a4] ss:$16 sps:$4 sm:$0xff]   ;;  %v1221_v42 = vld [vmem:[%s1574_s18 + $0x1ac] ss:$16 sps:$4 sm:$0xff]   ;;  %s1011_s6 = sshll.u32 %s246_s26, 2 }
  0x70   : > { %662 = vmatprep.subr.bf16.mxu0 %v1183_v17  ;;  %705 = vmatprep.subr.bf16.mxu1 %v1185_v18  ;;  %v1223_v43 = vld [vmem:[%s1574_s18 + $0x1a0] ss:$16 sps:$4 sm:$0xff]   ;;  %v1224_v44 = vld [vmem:[%s1574_s18 + $0x1a8] ss:$16 sps:$4 sm:$0xff]   ;;  %v1225_v45 = vld [vmem:[%s1574_s18 + $0x184] ss:$16 sps:$4 sm:$0xff]  }
  0x71   : > { %v1227_v46 = vld [vmem:[%s1574_s18 + $0x18c] ss:$16 sps:$4 sm:$0xff]   ;;  %s1633_s30 = scalar_lea.vmem [#allocation3], %s1011_s6  ;;  %v1229_v48 = vld [vmem:[%s1574_s18 + $0x180] ss:$16 sps:$4 sm:$0xff]  }
  0x72   : > { %v1257_v47 = vld [vmem:[%s1633_s30 + $0x4] ss:$24 sps:$4 sm:$0xff]   ;;  %v1230_v49 = vld [vmem:[%s1574_s18 + $0x188] ss:$16 sps:$4 sm:$0xff]   ;;  %v1235_v52 = vld [vmem:[%s1574_s18 + $0x160] ss:$16 sps:$4 sm:$0xff]  }
  0x73   : > { %663 = vmatpush1.bf16.msra.mxu0 %v1187_v19  ;;  %706 = vmatpush1.bf16.msra.mxu1 %v1188_v20  ;;  %v1231_v50 = vld [vmem:[%s1574_s18 + $0x164] ss:$16 sps:$4 sm:$0xff]   ;;  %v1233_v51 = vld [vmem:[%s1574_s18 + $0x16c] ss:$16 sps:$4 sm:$0xff]   ;;  %v1236_v53 = vld [vmem:[%s1574_s18 + $0x168] ss:$16 sps:$4 sm:$0xff]  }
  0x74   : > { %664 = vmatprep.subr.bf16.mxu0 %v1189_v21  ;;  %707 = vmatprep.subr.bf16.mxu1 %v1191_v22  ;;  %v1237_v54 = vld [vmem:[%s1574_s18 + $0x144] ss:$16 sps:$4 sm:$0xff]   ;;  %v1239_v55 = vld [vmem:[%s1574_s18 + $0x14c] ss:$16 sps:$4 sm:$0xff]   ;;  %v1241_v56 = vld [vmem:[%s1574_s18 + $0x140] ss:$16 sps:$4 sm:$0xff]  }
  0x75   : > { %686 = vmatprep.mubr.bf16.mxu0 %v1257_v47  ;;  %729 = vmatprep.mubr.bf16.mxu1 %v1257_v47  ;;  %v1242_v57 = vld [vmem:[%s1574_s18 + $0x148] ss:$16 sps:$4 sm:$0xff]   ;;  %v1243_v58 = vld [vmem:[%s1574_s18 + $0x124] ss:$16 sps:$4 sm:$0xff]   ;;  %v1245_v59 = vld [vmem:[%s1574_s18 + $0x12c] ss:$16 sps:$4 sm:$0xff]  }
  0x76   : > { %v1247_v60 = vld [vmem:[%s1574_s18 + $0x120] ss:$16 sps:$4 sm:$0xff]   ;;  %v1248_v61 = vld [vmem:[%s1574_s18 + $0x128] ss:$16 sps:$4 sm:$0xff]   ;;  %v1249_v62 = vld [vmem:[%s1574_s18 + $0x104] ss:$16 sps:$4 sm:$0xff]  }
  0x77   : > { %665 = vmatpush1.bf16.msra.mxu0 %v1193_v23  ;;  %708 = vmatpush1.bf16.msra.mxu1 %v1194_v24  ;;  %v1251_v63 = vld [vmem:[%s1574_s18 + $0x10c] ss:$16 sps:$4 sm:$0xff]   ;;  %v1253_v0 = vld [vmem:[%s1574_s18 + $0x100] ss:$16 sps:$4 sm:$0xff]   ;;  %v1254_v1 = vld [vmem:[%s1574_s18 + $0x108] ss:$16 sps:$4 sm:$0xff]  }
  0x78   : > { %666 = vmatprep.subr.bf16.mxu0 %v1195_v25  ;;  %709 = vmatprep.subr.bf16.mxu1 %v1197_v26  ;;  %v1255_v2 = vld [vmem:[%s1633_s30] ss:$24 sps:$4 sm:$0xff]   ;;  %v252_v3 = vld [vmem:[#allocation2 + $0x30] sm:$0xff]  ;;  %v256_v13 = vld [vmem:[#allocation2 + $0x8] sm:$0xff] }
  0x79   : > { %v254_v4 = vld [vmem:[#allocation2 + $0x18] sm:$0xff]  ;;  %v253_v7 = vld [vmem:[#allocation2] sm:$0xff]  ;;  %v255_v8 = vld [vmem:[#allocation2 + $0x10] sm:$0xff] }
  0x7a   : > { %v258_v14 = vld [vmem:[#allocation2 + $0x28] sm:$0xff]  ;;  %v257_v19 = vld [vmem:[#allocation2 + $0x20] sm:$0xff]  ;;  %v259_v20 = vld [vmem:[#allocation2 + $0x38] sm:$0xff] }
  0x7b   : > { %667 = vmatpush1.bf16.msra.mxu0 %v1199_v27  ;;  %710 = vmatpush1.bf16.msra.mxu1 %v1200_v28 }
  0x7c   : > { %668 = vmatprep.subr.bf16.mxu0 %v1201_v29  ;;  %711 = vmatprep.subr.bf16.mxu1 %v1203_v30 }
  0x7f   : > { %669 = vmatpush1.bf16.msra.mxu0 %v1205_v31  ;;  %712 = vmatpush1.bf16.msra.mxu1 %v1206_v32 }
  0x80   : > { %670 = vmatprep.subr.bf16.mxu0 %v1207_v33  ;;  %713 = vmatprep.subr.bf16.mxu1 %v1209_v34 }
  0x83   : > { %671 = vmatpush2.bf16.msra.mxu0 %v1211_v35  ;;  %714 = vmatpush2.bf16.msra.mxu1 %v1212_v36 }
  0x84   : > { %672 = vmatprep.subr.bf16.mxu0 %v1213_v37  ;;  %715 = vmatprep.subr.bf16.mxu1 %v1215_v38 }
  0x87   : > { %673 = vmatpush2.bf16.msra.mxu0 %v1217_v39  ;;  %716 = vmatpush2.bf16.msra.mxu1 %v1218_v40 }
  0x88   : > { %674 = vmatprep.subr.bf16.mxu0 %v1219_v41  ;;  %717 = vmatprep.subr.bf16.mxu1 %v1221_v42 }
  0x8b   : > { %675 = vmatpush2.bf16.msra.mxu0 %v1223_v43  ;;  %718 = vmatpush2.bf16.msra.mxu1 %v1224_v44 }
  0x8c   : > { %676 = vmatprep.subr.bf16.mxu0 %v1225_v45  ;;  %719 = vmatprep.subr.bf16.mxu1 %v1227_v46 }
  0x8f   : > { %677 = vmatpush2.bf16.msra.mxu0 %v1229_v48  ;;  %720 = vmatpush2.bf16.msra.mxu1 %v1230_v49 }
  0x90   : > { %678 = vmatprep.subr.bf16.mxu0 %v1231_v50  ;;  %721 = vmatprep.subr.bf16.mxu1 %v1233_v51 }
  0x93   : > { %679 = vmatpush2.bf16.msra.mxu0 %v1235_v52  ;;  %722 = vmatpush2.bf16.msra.mxu1 %v1236_v53 }
  0x94   : > { %680 = vmatprep.subr.bf16.mxu0 %v1237_v54  ;;  %723 = vmatprep.subr.bf16.mxu1 %v1239_v55 }
  0x97   : > { %681 = vmatpush2.bf16.msra.mxu0 %v1241_v56  ;;  %724 = vmatpush2.bf16.msra.mxu1 %v1242_v57 }
  0x98   : > { %682 = vmatprep.subr.bf16.mxu0 %v1243_v58  ;;  %725 = vmatprep.subr.bf16.mxu1 %v1245_v59 }
  0x9b   : > { %683 = vmatpush2.bf16.msra.mxu0 %v1247_v60  ;;  %726 = vmatpush2.bf16.msra.mxu1 %v1248_v61 }
  0x9c   : > { %684 = vmatprep.subr.bf16.mxu0 %v1249_v62  ;;  %727 = vmatprep.subr.bf16.mxu1 %v1251_v63 }
  0x9f   : > { %685 = vmatpush2.bf16.msra.mxu0 %v1253_v0  ;;  %728 = vmatpush2.bf16.msra.mxu1 %v1254_v1 }
  0xa2   : > { %687 = vmatmul.mubr.bf16.vlgmr.msra.gmra.mxu0 %v1255_v2  ;;  %730 = vmatmul.mubr.bf16.vlgmr.msra.gmra.mxu1 %v1255_v2 }
 0x162   : > { %v688_v5 = vpop.f32.mrf.mxu0  ;;  %v731_v6 = vpop.f32.mrf.mxu1 }
 0x163   : > { %v740_v9 = vadd.f32 %v688_v5, %v252_v3  ;;  %v742_v10 = vadd.f32 %v731_v6, %v254_v4 }
 0x164   : > { %v690_v11 = vpop.f32.mrf.mxu0  ;;  %v733_v12 = vpop.f32.mrf.mxu1 }
 0x165   : > { %748 = vst [vmem:[#allocation2 + $0x30] sm:$0xff] %v740_v9  ;;  %750 = vst [vmem:[#allocation2 + $0x18] sm:$0xff] %v742_v10  ;;  %v741_v15 = vadd.f32 %v690_v11, %v253_v7  ;;  %v743_v16 = vadd.f32 %v733_v12, %v255_v8 }
 0x166   : > { %v692_v17 = vpop.f32.mrf.mxu0  ;;  %v735_v18 = vpop.f32.mrf.mxu1 }
 0x167   : > { %749 = vst [vmem:[#allocation2] sm:$0xff] %v741_v15  ;;  %751 = vst [vmem:[#allocation2 + $0x10] sm:$0xff] %v743_v16  ;;  %v744_v21 = vadd.f32 %v692_v17, %v256_v13  ;;  %v746_v22 = vadd.f32 %v735_v18, %v258_v14  ;;  %759 = sbr.rel (%p1078_p11) target bundleno = 1066 (0x42a), region = 56 }
 0x168   : > { %v694_v23 = vpop.f32.mrf.mxu0  ;;  %v737_v24 = vpop.f32.mrf.mxu1 }
 0x169   : > { %752 = vst [vmem:[#allocation2 + $0x8] sm:$0xff] %v744_v21  ;;  %754 = vst [vmem:[#allocation2 + $0x28] sm:$0xff] %v746_v22  ;;  %v745_v25 = vadd.f32 %v694_v23, %v257_v19  ;;  %v747_v26 = vadd.f32 %v737_v24, %v259_v20 }
 0x16b   : > { %753 = vst [vmem:[#allocation2 + $0x20] sm:$0xff] %v745_v25  ;;  %755 = vst [vmem:[#allocation2 + $0x38] sm:$0xff] %v747_v26 }
 0x16c   : > { %v766_v27 = vlaneseq  ;;  %v764_v29 = vld [vmem:[#allocation8] sm:$0xf]  ;;  %v762_v36 = vld [vmem:[#allocation2 + $0x18] sm:$0xff]  ;;  %vm794_vm0 = vcmask 1041408   ;;  %vm810_vm1 = vcmask 1043458   ;;  %vm900_vm2 = vcmask 1024  }
 0x16d   : > { %v760_v30 = vld [vmem:[#allocation2 + $0x30] sm:$0xff]  ;;  %vm914_vm3 = vcmask 0  }
 0x16e   : > { %v1656_v28 = vshrl.u32 %v766_v27, 7  ;;  %v761_v35 = vld [vmem:[#allocation2] sm:$0xff]  ;;  %v763_v37 = vld [vmem:[#allocation2 + $0x10] sm:$0xff] }
 0x170   : > { %v768_v31 = vsub.s32 0, %v1656_v28  ;;  %v772_v32 = vsub.s32 1, %v1656_v28  ;;  %v776_v33 = vsub.s32 2, %v1656_v28  ;;  %v780_v34 = vsub.s32 3, %v1656_v28 }
 0x172   : > { %v769_v38 = vrot.slane %v764_v29, %v768_v31  ;;  %v773_v39 = vrot.slane %v764_v29, %v772_v32  ;;  %v777_v40 = vrot.slane %v764_v29, %v776_v33  ;;  %v781_v41 = vrot.slane %v764_v29, %v780_v34 }
 0x174   : > { %v786_v42 = vadd.f32 %v769_v38, %v760_v30  ;;  %v787_v43 = vadd.f32 %v773_v39, %v761_v35  ;;  %v788_v44 = vadd.f32 %v777_v40, %v762_v36  ;;  %v789_v45 = vadd.f32 %v781_v41, %v763_v37  ;;  %v861_v40 = vld [vmem:[%s1721_s3] sm:$0xf] }
 0x175   : > { %v866_v41 = vrot.slane %v861_v40, %v768_v31 }
 0x176   : > { %v790_v46 = vmul.f32 %v786_v42, %v786_v42  ;;  %v791_v47 = vmul.f32 %v787_v43, %v787_v43  ;;  %v792_v48 = vmul.f32 %v788_v44, %v788_v44  ;;  %v793_v49 = vmul.f32 %v789_v45, %v789_v45 }
 0x178   : > { %v795_v50 = vsel %vm794_vm0, %v790_v46, 0.0  ;;  %v796_v51 = vsel %vm794_vm0, %v791_v47, 0.0  ;;  %v798_v52 = vsel %vm794_vm0, %v792_v48, 0.0  ;;  %v811_v54 = vsel %vm810_vm1, %v790_v46, 0.0 }
 0x179   : > { %v797_v53 = vadd.f32 %v796_v51, %v795_v50  ;;  %v812_v55 = vsel %vm810_vm1, %v791_v47, 0.0  ;;  %v814_v56 = vsel %vm810_vm1, %v792_v48, 0.0  ;;  %v800_v57 = vsel %vm794_vm0, %v793_v49, 0.0 }
 0x17a   : > { %v813_v58 = vadd.f32 %v812_v55, %v811_v54  ;;  %v816_v61 = vsel %vm810_vm1, %v793_v49, 0.0 }
 0x17b   : > { %v799_v59 = vadd.f32 %v798_v52, %v797_v53 }
 0x17c   : > { %v815_v60 = vadd.f32 %v814_v56, %v813_v58 }
 0x17d   : > { %v801_v62 = vadd.f32 %v800_v57, %v799_v59 }
 0x17e   : > { %v817_v63 = vadd.f32 %v816_v61, %v815_v60 }
 0x17f   : > { %802 = vadd.xlane.f32.xlu0 %v801_v62 }
 0x183   : > { %818 = vadd.xlane.f32.xlu0 %v817_v63 }
 0x208   : > { %v803_v0 = vpop.xlane.xlu0 %802 }
 0x209   : > { %v804_v1 = vadd.f32 1e-12, %v803_v0 }
 0x20b   : > { %1258 = vrsqrt.f32 %v804_v1 }
 0x20c   : > { %v819_v2 = vpop.xlane.xlu0 %818 }
 0x20d   : > { %v820_v3 = vadd.f32 1e-12, %v819_v2 }
 0x20f   : > { %1260 = vrsqrt.f32 %v820_v3 }
 0x218   : > { %v1259_v4 = vpop.eup %1258 }
 0x219   : > { %v806_v5 = vmul.f32 %v1259_v4, %v786_v42  ;;  %v807_v6 = vmul.f32 %v1259_v4, %v787_v43  ;;  %v808_v7 = vmul.f32 %v1259_v4, %v788_v44  ;;  %v809_v8 = vmul.f32 %v1259_v4, %v789_v45 }
 0x21b   : > { %v830_v10 = vrot.slane %v806_v5, 6  ;;  %v831_v11 = vrot.slane %v807_v6, 6  ;;  %v832_v12 = vrot.slane %v808_v7, 6  ;;  %v833_v13 = vrot.slane %v809_v8, 6 }
 0x21c   : > { %v1261_v9 = vpop.eup %1260 }
 0x21d   : > { %v822_v14 = vmul.f32 %v1261_v9, %v786_v42  ;;  %v823_v15 = vmul.f32 %v1261_v9, %v787_v43  ;;  %v824_v16 = vmul.f32 %v1261_v9, %v788_v44  ;;  %v825_v17 = vmul.f32 %v1261_v9, %v789_v45 }
 0x21e   : > { %v870_v42 = vrot.slane %v861_v40, %v772_v32  ;;  %v874_v43 = vrot.slane %v861_v40, %v776_v33  ;;  %v878_v45 = vrot.slane %v861_v40, %v780_v34 }
 0x21f   : > { %v838_v18 = vsub.f32 %v822_v14, %v830_v10  ;;  %v839_v19 = vsub.f32 %v823_v15, %v831_v11  ;;  %v840_v20 = vsub.f32 %v824_v16, %v832_v12  ;;  %v841_v21 = vsub.f32 %v825_v17, %v833_v13 }
 0x221   : > { %v842_v22 = vmul.f32 %v838_v18, %v838_v18  ;;  %v843_v23 = vmul.f32 %v839_v19, %v839_v19  ;;  %v844_v24 = vmul.f32 %v840_v20, %v840_v20  ;;  %v845_v25 = vmul.f32 %v841_v21, %v841_v21 }
 0x223   : > { %v846_v26 = vsel %vm810_vm1, %v842_v22, 0.0  ;;  %v847_v27 = vsel %vm810_vm1, %v843_v23, 0.0  ;;  %v849_v30 = vsel %vm810_vm1, %v844_v24, 0.0  ;;  %v851_v36 = vsel %vm810_vm1, %v845_v25, 0.0 }
 0x224   : > { %v848_v29 = vadd.f32 %v847_v27, %v846_v26 }
 0x226   : > { %v850_v35 = vadd.f32 %v849_v30, %v848_v29 }
 0x228   : > { %v852_v37 = vadd.f32 %v851_v36, %v850_v35 }
 0x22a   : > { %853 = vadd.xlane.f32.xlu1 %v852_v37 }
 0x2b3   : > { %v854_v38 = vpop.xlane.xlu1 %853 }
 0x2b4   : > { %v855_v39 = vadd.f32 1e-12, %v854_v38 }
 0x2b6   : > { %1262 = vrsqrt.f32 %v855_v39 }
 0x2c3   : > { %v1263_v44 = vpop.eup %1262 }
 0x2c4   : > { %v857_v46 = vmul.f32 %v1263_v44, %v838_v18  ;;  %v858_v47 = vmul.f32 %v1263_v44, %v839_v19  ;;  %v859_v48 = vmul.f32 %v1263_v44, %v840_v20  ;;  %v860_v49 = vmul.f32 %v1263_v44, %v841_v21 }
 0x2c6   : > { %v883_v50 = vmul.f32 %v866_v41, %v857_v46  ;;  %v884_v51 = vmul.f32 %v870_v42, %v858_v47  ;;  %v885_v52 = vmul.f32 %v874_v43, %v859_v48  ;;  %v886_v53 = vmul.f32 %v878_v45, %v860_v49 }
 0x2c8   : > { %v887_v31 = vsel %vm810_vm1, %v883_v50, 0.0  ;;  %v888_v54 = vsel %vm810_vm1, %v884_v51, 0.0  ;;  %v890_v55 = vsel %vm810_vm1, %v885_v52, 0.0  ;;  %v892_v56 = vsel %vm810_vm1, %v886_v53, 0.0 }
 0x2c9   : > { %v889_v32 = vadd.f32 %v888_v54, %v887_v31 }
 0x2cb   : > { %v891_v33 = vadd.f32 %v890_v55, %v889_v32 }
 0x2cd   : > { %v893_v28 = vadd.f32 %v892_v56, %v891_v33 }
 0x2cf   : > { %894 = vadd.xlane.f32.xlu1 %v893_v28 }
 0x358   : > { %v895_v34 = vpop.xlane.xlu1 %894 }
 0x359   : > { %v896_v57 = vsub.f32 1.0, %v895_v34 }
 0x35b   : > { %v898_v58 = vrot.slane %v896_v57, 2 }
 0x35d   : > { %v901_v59 = vsel %vm900_vm2, %v898_v58, 0.0 }
 0x35e   : > { %902 = vadd.xlane.f32.xlu0 %v901_v59 }
 0x3e7   : > { %v903_v60 = vpop.xlane.xlu0 %902 }
 0x3e8   : > { %v904_v61 = vrot.slane %v903_v60, 4 }
 0x3ea   : > { %v905_v62 = vadd.f32 %v904_v61, %v903_v60 }
 0x3ec   : > { %v906_v63 = vrot.slane %v905_v62, 2 }
 0x3ee   : > { %v907_v0 = vadd.f32 %v906_v63, %v905_v62 }
 0x3f0   : > { %v908_v1 = vrot.slane %v907_v0, 1 }
 0x3f2   : > { %v909_v2 = vadd.f32 %v908_v1, %v907_v0 }
 0x3f4   : > { %1085 = vpush %v909_v2 }
 0x425   : > { %s1086_s5 = spop %1085 }
 0x426   : > { %v911_v3 = vstv %s1086_s5 }
 0x427   : > { %v913_v4 = vmul.f32 0.5, %v911_v3 }
 0x429   : > { %915 = vst.msk [vmem:[#allocation9] sm:$0x1] %vm914_vm3, %v913_v4 }
 0x42a PF: > { %p1117_p4 = scmp.eq.s32.totalorder %s1469_s19, 2  ;;  %s1424_s10 = smov [#allocation9]  }
 0x42b   : > { %s923_s11 = sshll.u32 %s1424_s10, 4  ;;  %s924_s11 = int_to_ptr.vmem [resolvable:$true] %s923_s11 }
 0x42c   : > { %s1344_s12 = scalar_lea.vmem %s924_s11, 16  ;;  %s1350_s13 = scalar_lea.vmem %s924_s11, 32 }
 0x42d   : > { %p1345_p12 = scmp.ne.s32.totalorder %s924_s11, %s1344_s12  ;;  %p1351_p5 = scmp.lt.s32.totalorder %s924_s11, %s924_s11 }
 0x42e   : > { %p1352_p10 = scmp.lt.s32.totalorder %s1350_s13, %s1344_s12 }
 0x42f   : > { %p1346_p2 = pnand %p1345_p12, %p1117_p4 }
 0x430   : > { %p1353_p9 = por %p1352_p10, %p1351_p5 }
 0x431   : > { %p1347_p3 = pneg %p1346_p2 }
 0x433   : > { %p1354_p13 = pnand %p1353_p9, %p1347_p3 }
 0x435   : > { %1357 = shalt.err (!%p1354_p13)
}
 0x436   : > { %1098 = dma.vmem_to_hbm [thread:$0]  (%p1117_p4), %s924_s11, 16, %s1722_s4, [#allocation5]  }
 0x437   : > { %1397 = dma.done.wait (%p1117_p4), [#allocation5], 16  }
 0x438   : > { %1399 = vsyncadd (%p1117_p4), [#allocation5], 4294967280 }
 0x439 PF: > { %p16_p0 = scmp.ge.s32.totalorder %s1472_s20, 5   ;;  %s1740_s15 = smov %s1406_s16 }
 0x43a   : > { %s1741_s16 = smov %s1410_s17  ;;  %s1742_s17 = smov %s1482_s23 }
 0x43b   : > { %s1743_s18 = smov %s1472_s20  ;;  %18 = sbr.rel (!%p16_p0) target bundleno = 5 (0x5), region = 91 }
 0x440   :  { %936 = vsyncpa [#allocation4], 1 }
 0x441   :  { %938 = vsyncpa [#allocation4 + $0x1], 1 }
 0x442   :  { %939 = vsyncpa [#allocation7], 1 }
 0x443   :  { %941 = vsyncpa [#allocation7 + $0x1], 1 }
 0x444   :  { %942 = vsyncpa [#allocation5], 1 }
 0x445   :  { %944 = vsyncpa [#allocation5 + $0x1], 1 }

</bundles_post_ra>
